<compile_context>
chip_gen: v6e
topology: v6e:2x2x1
jax: 0.10.0
libtpu: 0.0.40
codegen_flags: <defaults>
</compile_context>

<pallas_src>
import functools

import jax
import jax.numpy as jnp
from jax.experimental import pallas as pl
from jax.experimental.pallas import tpu as pltpu

_LANE = 128            # lanes per vreg
_MAX_BLOCK_ROWS = 1024 # 1024 x 128 f32 = 512 KiB per input block (x2 inputs x2 bufs = 2 MiB)
_NCORES = 2            # leading parallel grid axis (exploits v7x's 2 TCs; harmless on 1-TC chips)


def _iou_partials_kernel(x_ref, y_ref, out_ref, acc_prod_ref, acc_sum_ref, *,
                         block_rows, rows_valid, steps_per_core):
    c = pl.program_id(0)   # parallel (core) axis
    j = pl.program_id(1)   # reduction axis

    @pl.when(j == 0)
    def _():
        acc_prod_ref[...] = jnp.zeros_like(acc_prod_ref)
        acc_sum_ref[...] = jnp.zeros_like(acc_sum_ref)

    # Mask rows past the end of the (logical, unclamped) block.  The index_map
    # clamps the block index so the DMA stays in bounds; the mask (computed from
    # the *logical* index) zeroes any overhang / redundant clamped block.
    row0 = (c * steps_per_core + j) * block_rows
    row_ids = row0 + jax.lax.broadcasted_iota(jnp.int32, x_ref.shape, 0)
    mask = row_ids < rows_valid

    x = jnp.where(mask, x_ref[...].astype(jnp.float32), 0.0)
    y = jnp.where(mask, y_ref[...].astype(jnp.float32), 0.0)

    acc_prod_ref[...] += x * y        # intersection partials
    acc_sum_ref[...] += x + y         # total partials

    @pl.when(j == pl.num_programs(1) - 1)
    def _():
        prods = jnp.sum(acc_prod_ref[...], axis=0, keepdims=True)   # (1, 128)
        sums = jnp.sum(acc_sum_ref[...], axis=0, keepdims=True)     # (1, 128)
        out_ref[...] = jnp.concatenate([prods, sums], axis=0)[None]  # (1, 2, 128)


def iou_pallas(inputs, targets, smooth=1.0):
    """Matches IoU.forward(inputs, targets, smooth) from eval_binary.py."""
    x = jnp.reshape(inputs, (-1,))
    y = jnp.reshape(targets, (-1,))
    # Keep floating dtypes as-is (halves HBM traffic for bf16); cast in-kernel.
    if not jnp.issubdtype(x.dtype, jnp.floating):
        x = x.astype(jnp.float32)
    if not jnp.issubdtype(y.dtype, jnp.floating):
        y = y.astype(jnp.float32)
    n = x.shape[0]

    # Only pad to the next lane multiple (at most 127 elems) so the 1D->2D
    # reshape is layout-free.  Zero padding contributes 0 to both sums.
    pad = (-n) % _LANE
    if pad:
        x = jnp.pad(x, (0, pad))
        y = jnp.pad(y, (0, pad))
    rows = (n + pad) // _LANE
    x2 = x.reshape(rows, _LANE)
    y2 = y.reshape(rows, _LANE)

    # Block never exceeds the array's row extent (small inputs use a full-array block).
    block_rows = rows if rows <= _MAX_BLOCK_ROWS else _MAX_BLOCK_ROWS
    num_blocks = (rows + block_rows - 1) // block_rows
    steps_per_core = (num_blocks + _NCORES - 1) // _NCORES
    last_block = num_blocks - 1

    def in_map(c, j):
        # Clamp so the DMA'd block index is always valid; redundant (clamped)
        # steps are fully masked inside the kernel.
        return (jnp.minimum(c * steps_per_core + j, last_block), 0)

    out = pl.pallas_call(
        functools.partial(
            _iou_partials_kernel,
            block_rows=block_rows,
            rows_valid=rows,
            steps_per_core=steps_per_core,
        ),
        out_shape=jax.ShapeDtypeStruct((_NCORES, 2, _LANE), jnp.float32),
        grid_spec=pltpu.PrefetchScalarGridSpec(
            num_scalar_prefetch=0,
            grid=(_NCORES, steps_per_core),
            in_specs=[
                pl.BlockSpec((block_rows, _LANE), in_map),
                pl.BlockSpec((block_rows, _LANE), in_map),
            ],
            out_specs=pl.BlockSpec((1, 2, _LANE), lambda c, j: (c, 0, 0)),
            scratch_shapes=[
                pltpu.VMEM((block_rows, _LANE), jnp.float32),
                pltpu.VMEM((block_rows, _LANE), jnp.float32),
            ],
        ),
        compiler_params=pltpu.CompilerParams(
            dimension_semantics=("parallel", "arbitrary"),
        ),
    )(x2, y2)

    # Final combine (tiny) in JAX: sum the per-core / per-lane partials.
    intersection = jnp.sum(out[:, 0, :])
    total = jnp.sum(out[:, 1, :])
    union = total - intersection
    return (intersection + smooth) / (union + smooth)


def iou_ref(inputs, targets, smooth=1.0):
    x = jnp.reshape(inputs, (-1,)).astype(jnp.float32)
    y = jnp.reshape(targets, (-1,)).astype(jnp.float32)
    intersection = jnp.sum(x * y)
    total = jnp.sum(x + y)
    union = total - intersection
    return (intersection + smooth) / (union + smooth)


if __name__ == "__main__":
    # The module has no parameters; nothing to initialize.
    key = jax.random.PRNGKey(0)
    k1, k2, k3, k4 = jax.random.split(key, 4)

    # Shapes consistent with a binary-segmentation eval: NCHW = (2, 1, 16, 16)
    inputs = jax.nn.sigmoid(jax.random.normal(k1, (2, 1, 16, 16), jnp.float32))
    targets = (jax.random.uniform(k2, (2, 1, 16, 16)) > 0.5).astype(jnp.float32)

    result = iou_pallas(inputs, targets, smooth=1.0)
    jax.block_until_ready(result)
    expected = iou_ref(inputs, targets, smooth=1.0)
    assert jnp.allclose(result, expected, rtol=1e-5, atol=1e-5), (result, expected)

    # Second check: non-lane-aligned size exercising the multi-block path,
    # the in-kernel tail mask and the clamped redundant parallel-axis block.
    inputs2 = jax.nn.sigmoid(jax.random.normal(k3, (2, 3, 200, 220), jnp.float32))
    targets2 = (jax.random.uniform(k4, (2, 3, 200, 220)) > 0.5).astype(jnp.float32)
    result2 = iou_pallas(inputs2, targets2, smooth=1.0)
    jax.block_until_ready(result2)
    expected2 = iou_ref(inputs2, targets2, smooth=1.0)
    assert jnp.allclose(result2, expected2, rtol=1e-4, atol=1e-5), (result2, expected2)

    print("KERNEL_OK")
</pallas_src>

<mosaic_0001>
module attributes {stable_mosaic.version = 11 : i64} {
  func.func @_iou_partials_kernel(%arg0: i32, %arg1: i32, %arg2: memref<4x128xf32, #tpu.memory_space<vmem>>, %arg3: memref<4x128xf32, #tpu.memory_space<vmem>>, %arg4: memref<1x2x128xf32, #tpu.memory_space<vmem>>, %arg5: memref<4x128xf32, #tpu.memory_space<vmem>>, %arg6: memref<4x128xf32, #tpu.memory_space<vmem>>) attributes {dimension_semantics = [#tpu.dimension_semantics<parallel>, #tpu.dimension_semantics<arbitrary>], iteration_bounds = array<i64: 2, 1>, scalar_prefetch = 0 : i64, scratch_operands = 2 : i64, tpu.core_type = #tpu.core_type<tc>, window_params = [{transform_indices = @transform_0, window_bounds = array<i64: 4, 128>}, {transform_indices = @transform_1, window_bounds = array<i64: 4, 128>}, {transform_indices = @transform_2, window_bounds = array<i64: 1, 2, 128>}]} {
    %c0_i32 = arith.constant 0 : i32
    %0 = arith.cmpi eq, %arg1, %c0_i32 : i32
    %1 = arith.extui %0 : i1 to i32
    %c0_i32_0 = arith.constant 0 : i32
    %2 = arith.cmpi ne, %1, %c0_i32_0 : i32
    scf.if %2 {
      %cst_16 = arith.constant 0.000000e+00 : f32
      %28 = vector.broadcast %cst_16 : f32 to vector<4x128xf32>
      %c0_17 = arith.constant 0 : index
      %c0_18 = arith.constant 0 : index
      %29 = vector.load %arg5[%c0_17, %c0_18] : memref<4x128xf32, #tpu.memory_space<vmem>>, vector<4x128xf32>
      tpu.vector_store %arg5[%c0_17, %c0_18], %28 {strides = array<i32>} : memref<4x128xf32, #tpu.memory_space<vmem>>, vector<4x128xf32>,
      %cst_19 = arith.constant 0.000000e+00 : f32
      %30 = vector.broadcast %cst_19 : f32 to vector<4x128xf32>
      %c0_20 = arith.constant 0 : index
      %c0_21 = arith.constant 0 : index
      %31 = vector.load %arg6[%c0_20, %c0_21] : memref<4x128xf32, #tpu.memory_space<vmem>>, vector<4x128xf32>
      tpu.vector_store %arg6[%c0_20, %c0_21], %30 {strides = array<i32>} : memref<4x128xf32, #tpu.memory_space<vmem>>, vector<4x128xf32>,
    } else {
    }
    %c1_i32 = arith.constant 1 : i32
    %3 = arith.muli %arg0, %c1_i32 : i32
    %4 = arith.addi %3, %arg1 : i32
    %c4_i32 = arith.constant 4 : i32
    %5 = arith.muli %4, %c4_i32 : i32
    %6 = tpu.iota {dimensions = array<i32: 0>} : vector<4x128xi32>
    %7 = vector.broadcast %5 : i32 to vector<4x128xi32>
    %8 = arith.addi %7, %6 : vector<4x128xi32>
    %c4_i32_1 = arith.constant 4 : i32
    %9 = vector.broadcast %c4_i32_1 : i32 to vector<4x128xi32>
    %10 = arith.cmpi slt, %8, %9 : vector<4x128xi32>
    %c0 = arith.constant 0 : index
    %c0_2 = arith.constant 0 : index
    %11 = vector.load %arg2[%c0, %c0_2] : memref<4x128xf32, #tpu.memory_space<vmem>>, vector<4x128xf32>
    %cst = arith.constant 0.000000e+00 : f32
    %12 = vector.broadcast %cst : f32 to vector<4x128xf32>
    %13 = arith.select %10, %11, %12 : vector<4x128xi1>, vector<4x128xf32>
    %c0_3 = arith.constant 0 : index
    %c0_4 = arith.constant 0 : index
    %14 = vector.load %arg3[%c0_3, %c0_4] : memref<4x128xf32, #tpu.memory_space<vmem>>, vector<4x128xf32>
    %cst_5 = arith.constant 0.000000e+00 : f32
    %15 = vector.broadcast %cst_5 : f32 to vector<4x128xf32>
    %16 = arith.select %10, %14, %15 : vector<4x128xi1>, vector<4x128xf32>
    %c0_6 = arith.constant 0 : index
    %c0_7 = arith.constant 0 : index
    %17 = vector.load %arg5[%c0_6, %c0_7] : memref<4x128xf32, #tpu.memory_space<vmem>>, vector<4x128xf32>
    %18 = arith.mulf %13, %16 : vector<4x128xf32>
    %19 = arith.addf %17, %18 : vector<4x128xf32>
    %c0_8 = arith.constant 0 : index
    %c0_9 = arith.constant 0 : index
    %20 = vector.load %arg5[%c0_8, %c0_9] : memref<4x128xf32, #tpu.memory_space<vmem>>, vector<4x128xf32>
    tpu.vector_store %arg5[%c0_8, %c0_9], %19 {strides = array<i32>} : memref<4x128xf32, #tpu.memory_space<vmem>>, vector<4x128xf32>,
    %c0_10 = arith.constant 0 : index
    %c0_11 = arith.constant 0 : index
    %21 = vector.load %arg6[%c0_10, %c0_11] : memref<4x128xf32, #tpu.memory_space<vmem>>, vector<4x128xf32>
    %22 = arith.addf %13, %16 : vector<4x128xf32>
    %23 = arith.addf %21, %22 : vector<4x128xf32>
    %c0_12 = arith.constant 0 : index
    %c0_13 = arith.constant 0 : index
    %24 = vector.load %arg6[%c0_12, %c0_13] : memref<4x128xf32, #tpu.memory_space<vmem>>, vector<4x128xf32>
    tpu.vector_store %arg6[%c0_12, %c0_13], %23 {strides = array<i32>} : memref<4x128xf32, #tpu.memory_space<vmem>>, vector<4x128xf32>,
    %c0_i32_14 = arith.constant 0 : i32
    %25 = arith.cmpi eq, %arg1, %c0_i32_14 : i32
    %26 = arith.extui %25 : i1 to i32
    %c0_i32_15 = arith.constant 0 : i32
    %27 = arith.cmpi ne, %26, %c0_i32_15 : i32
    scf.if %27 {
      %c0_16 = arith.constant 0 : index
      %c0_17 = arith.constant 0 : index
      %28 = vector.load %arg5[%c0_16, %c0_17] : memref<4x128xf32, #tpu.memory_space<vmem>>, vector<4x128xf32>
      %cst_18 = arith.constant dense<0.000000e+00> : vector<128xf32>
      %29 = vector.multi_reduction <add>, %28, %cst_18 [0] : vector<4x128xf32> to vector<128xf32>
      %30 = vector.shape_cast %29 : vector<128xf32> to vector<1x128xf32>
      %c0_19 = arith.constant 0 : index
      %c0_20 = arith.constant 0 : index
      %31 = vector.load %arg6[%c0_19, %c0_20] : memref<4x128xf32, #tpu.memory_space<vmem>>, vector<4x128xf32>
      %cst_21 = arith.constant dense<0.000000e+00> : vector<128xf32>
      %32 = vector.multi_reduction <add>, %31, %cst_21 [0] : vector<4x128xf32> to vector<128xf32>
      %33 = vector.shape_cast %32 : vector<128xf32> to vector<1x128xf32>
      %34 = tpu.concatenate %30, %33 in 0 : vector<1x128xf32>, vector<1x128xf32> -> vector<2x128xf32>
      %35 = vector.shape_cast %34 : vector<2x128xf32> to vector<1x2x128xf32>
      %c0_22 = arith.constant 0 : index
      %c0_23 = arith.constant 0 : index
      %c0_24 = arith.constant 0 : index
      %36 = vector.load %arg4[%c0_22, %c0_23, %c0_24] : memref<1x2x128xf32, #tpu.memory_space<vmem>>, vector<1x2x128xf32>
      tpu.vector_store %arg4[%c0_22, %c0_23, %c0_24], %35 {strides = array<i32>} : memref<1x2x128xf32, #tpu.memory_space<vmem>>, vector<1x2x128xf32>,
    } else {
    }
    return
  }
  func.func @transform_0(%arg0: i32, %arg1: i32) -> (i32, i32) {
    %c1_i32 = arith.constant 1 : i32
    %0 = arith.muli %arg0, %c1_i32 : i32
    %1 = arith.addi %0, %arg1 : i32
    %c0_i32 = arith.constant 0 : i32
    %2 = arith.minsi %1, %c0_i32 : i32
    %c0_i32_0 = arith.constant 0 : i32
    %c0_i32_1 = arith.constant 0 : i32
    return %2, %c0_i32_0 : i32, i32
  }
  func.func @transform_1(%arg0: i32, %arg1: i32) -> (i32, i32) {
    %c1_i32 = arith.constant 1 : i32
    %0 = arith.muli %arg0, %c1_i32 : i32
    %1 = arith.addi %0, %arg1 : i32
    %c0_i32 = arith.constant 0 : i32
    %2 = arith.minsi %1, %c0_i32 : i32
    %c0_i32_0 = arith.constant 0 : i32
    %c0_i32_1 = arith.constant 0 : i32
    return %2, %c0_i32_0 : i32, i32
  }
  func.func @transform_2(%arg0: i32, %arg1: i32) -> (i32, i32, i32) {
    %c0_i32 = arith.constant 0 : i32
    %c0_i32_0 = arith.constant 0 : i32
    %c0_i32_1 = arith.constant 0 : i32
    return %arg0, %c0_i32, %c0_i32_0 : i32, i32, i32
  }
}

</mosaic_0001>

<bundles_post_ra>
// kernel: tpu_custom_call.1
= control target key start
LH: loop header
LB: loop body
LE: loop exit
PB: predicated region body
PF: predicated region fallthrough
CT: control target
= control target key end

     0   :  { %7 = vsyncpa [#allocation5], 0  ;;  %s875_s0 = inlined_call_operand.hbm [shape: f32[4,128], index: 0, kind: input, shape index: {}]   ;;  %s876_s1 = inlined_call_operand.hbm [shape: f32[4,128], index: 1, kind: input, shape index: {}]   ;;  %s877_s2 = inlined_call_operand.hbm [shape: f32[2,2,128], index: 2, kind: output, shape index: {}]  }
   0x1   :  { %9 = vsyncpa [#allocation5 + $0x1], 0 }
   0x2   :  { %10 = vsyncpa [#allocation8], 0 }
   0x3   :  { %12 = vsyncpa [#allocation8 + $0x1], 0 }
   0x4   :  { %13 = vsyncpa [#allocation6], 0 }
   0x5   :  { %15 = vsyncpa [#allocation6 + $0x1], 0  ;;  %s686_s9 = smov 0   ;;  %s688_s10 = smov 0  }
   0x6   :  { %s690_s11 = smov 0   ;;  %s692_s12 = smov 0  }
   0x7   :  { %s694_s13 = smov 0   ;;  %s696_s14 = smov 0  }
   0x8   :  { %s698_s15 = smov 0   ;;  %s700_s16 = smov 0  }
   0x9 LB: > { %s395_s17 = sadd.s32 4294967295, %s665_s16   ;;  %s396_s18 = sadd.s32 4294967294, %s665_s16   ;;  %s665_s16 = sphi %s700_s16, %s21_s16   ;;  %s661_s15 = sphi %s698_s15, %s898_s15   ;;  %s657_s14 = sphi %s696_s14, %s897_s14   ;;  %s653_s13 = sphi %s694_s13, %s865_s13   ;;  %s649_s12 = sphi %s692_s12, %s896_s12   ;;  %s645_s11 = sphi %s690_s11, %s895_s11   ;;  %s641_s10 = sphi %s688_s10, %s894_s10   ;;  %s637_s9 = sphi %s686_s9, %s893_s9  }
   0xa   : > { %s33_s19 = sadd.s32 1, %s661_s15  ;;  %p634_p1 = scmp.ne.s32.totalorder %s653_s13, 0 }
   0xb   : > { %p35_p0 = scmp.ge.s32.totalorder %s33_s19, 2  ;;  %p54_p2 = scmp.eq.s32.totalorder %s665_s16, 0 }
   0xc   : > { %p59_p3 = scmp.ne.s32.totalorder %s653_s13, %s649_s12  ;;  %p60_p5 = scmp.eq.s32.totalorder %s395_s17, 0 }
   0xd   : > { %s900_s19 = smov (%p35_p0, %s33_s19), 0  ;;  %p732_p4 = por %p634_p1, %p54_p2 }
   0xe   : > { %p736_p6 = por %p60_p5, %p59_p3  ;;  %s101_s22 = ssub.s32 %s661_s15, %s900_s19 }
   0xf   : > { %p102_p7 = scmp.eq.s32.totalorder %s101_s22, 0  ;;  %s104_s23 = sadd.s32 1, %s645_s11 }
  0x10   : > { %s881_s21 = scalar_select %p736_p6, 1, 0 }
  0x11   : > { %s744_s24 = scalar_select %p102_p7, %s645_s11, %s104_s23  }
  0x12   : > { %p114_p8 = scmp.ne.s32.totalorder %s645_s11, %s641_s10  ;;  %p115_p9 = scmp.eq.s32.totalorder %s395_s17, 1 }
  0x13   : > { %p120_p10 = scmp.ne.s32.totalorder %s641_s10, %s637_s9  ;;  %p121_p11 = scmp.eq.s32.totalorder %s396_s18, 1 }
  0x14   : > { %p750_p12 = por %p115_p9, %p114_p8  ;;  %p429_p1 = scmp.lt.s32.totalorder %s665_s16, 2 }
  0x15   : > { %p755_p0 = por %p121_p11, %p120_p10  ;;  %s667_s27 = smov [#allocation4]  }
  0x16   : > { %s882_s25 = scalar_select %p750_p12, 1, 0 }
  0x17   : > { %s883_s26 = scalar_select %p755_p0, 1, 0 }
  0x18   : > { %s155_s28 = sshll.u32 %s667_s27, 4  ;;  %p762_p2 = pnand %p429_p1, %p732_p4  ;;  %s156_s28 = int_to_ptr.vmem [resolvable:$true] %s155_s28 }
  0x19   : > { %s504_s4 = scalar_lea.hbm %s875_s0, 64 }
  0x1a   : > { %p505_p7 = scmp.ne.s32.totalorder %s875_s0, %s504_s4  ;;  %p506_p8 = pneg %p762_p2 }
  0x1b   : > { %p511_p10 = scmp.lt.s32.totalorder %s504_s4, %s504_s4 }
  0x1c   : > { %p507_p4 = pnand %p506_p8, %p505_p7 }
  0x1e   : > { %p508_p9 = pneg %p507_p4 }
  0x20   : > { %p513_p11 = pnand %p511_p10, %p508_p9 }
  0x22   : > { %516 = shalt.err (!%p513_p11)
}
  0x23   : > { %s517_s7 = scalar_lea.vmem %s156_s28, 64  ;;  %s524_s8 = scalar_lea.vmem %s156_s28, 128 }
  0x24   : > { %p518_p1 = scmp.ne.s32.totalorder %s156_s28, %s517_s7  ;;  %p525_p5 = scmp.lt.s32.totalorder %s156_s28, %s156_s28 }
  0x25   : > { %p526_p0 = scmp.lt.s32.totalorder %s524_s8, %s517_s7 }
  0x26   : > { %p520_p13 = pnand %p518_p1, %p506_p8 }
  0x27   : > { %p527_p12 = por %p526_p0, %p525_p5 }
  0x28   : > { %p521_p3 = pneg %p520_p13 }
  0x2a   : > { %p528_p6 = pnand %p527_p12, %p521_p3 }
  0x2c   : > { %531 = shalt.err (!%p528_p6)
}
  0x2d   : > { %421 = dma.hbm_to_vmem [thread:$0]  (!%p762_p2), %s875_s0, 64, %s156_s28, [#allocation5]  }
  0x2e   : > { %p885_p7 = scmp.lt.s32.totalorder %s665_s16, 3  ;;  %p886_p4 = scmp.ge.s32.totalorder %s665_s16, 1 }
  0x2f   : > { %s668_s20 = smov [#allocation7]   ;;  %s532_s30 = scalar_lea.hbm %s876_s1, 64 }
  0x30   : > { %p791_p9 = pnand %p886_p4, %p885_p7  ;;  %s176_s22 = sshll.u32 %s668_s20, 4  ;;  %s177_s22 = int_to_ptr.vmem [resolvable:$true] %s176_s22 }
  0x31   : > { %p533_p6 = scmp.ne.s32.totalorder %s876_s1, %s532_s30  ;;  %p539_p0 = scmp.lt.s32.totalorder %s532_s30, %s532_s30 }
  0x32   : > { %s887_s18 = scalar_select %p791_p9, 1, 0 }
  0x33   : > { %p535_p12 = pnand %p533_p6, %p506_p8 }
  0x35   : > { %p536_p13 = pneg %p535_p12 }
  0x37   : > { %p541_p3 = pnand %p539_p0, %p536_p13 }
  0x39   : > { %544 = shalt.err (!%p541_p3)
}
  0x3a   : > { %s545_s28 = scalar_lea.vmem %s177_s22, 64  ;;  %s552_s5 = scalar_lea.vmem %s177_s22, 128 }
  0x3b   : > { %p546_p5 = scmp.ne.s32.totalorder %s177_s22, %s545_s28  ;;  %p553_p1 = scmp.lt.s32.totalorder %s177_s22, %s177_s22 }
  0x3c   : > { %p554_p7 = scmp.lt.s32.totalorder %s552_s5, %s545_s28 }
  0x3d   : > { %p548_p10 = pnand %p546_p5, %p506_p8 }
  0x3e   : > { %p555_p4 = por %p554_p7, %p553_p1 }
  0x3f   : > { %p549_p11 = pneg %p548_p10 }
  0x41   : > { %p556_p9 = pnand %p555_p4, %p549_p11 }
  0x43   : > { %559 = shalt.err (!%p556_p9)
}
  0x44   : > { %424 = dma.hbm_to_vmem [thread:$0]  (!%p762_p2), %s876_s1, 64, %s177_s22, [#allocation8]  }
  0x45   : > { %p888_p6 = scmp.ne.s32.totalorder %s887_s18, 0 }
  0x46   : > { %s187_s8 = sand.u32 (!%p888_p6), 1, %s653_s13   ;;  %p889_p8 = scmp.ne.s32.totalorder (!%p888_p6), %s881_s21, 0 }
  0x47   : > { %185 = sbr.rel (%p888_p6) target bundleno = 126 (0x7e), region = 28  ;;  %s404_s12 = sshll.u32 (!%p888_p6), %s187_s8, 2 }
  0x48   : > { %s188_s17 = scalar_lea.sflag (!%p888_p6), [#allocation5], %s187_s8  ;;  %s191_s20 = scalar_lea.vmem (!%p888_p6), [#allocation4], %s404_s12 }
  0x4c   : > { %623 = dma.done.wait (%p889_p8), %s188_s17, 64  }
  0x4d   : > { %625 = vsyncadd (%p889_p8), %s188_s17, 4294967232  ;;  %s197_s29 = scalar_lea.sflag [#allocation8], %s187_s8  ;;  %s200_s23 = scalar_lea.vmem [#allocation7], %s404_s12 }
  0x4e   : > { %627 = dma.done.wait (%p889_p8), %s197_s29, 64  }
  0x4f   : > { %629 = vsyncadd (%p889_p8), %s197_s29, 4294967232  ;;  %s407_s18 = sshll.u32 %s657_s14, 2  ;;  %v240_v0 = vlaneseq  ;;  %v669_v1 = vmov 0.0   ;;  %v245_v5 = vld [vmem:[%s191_s20] sm:$0xf]  ;;  %vm261_vm1 = vcmask 1043456  }
  0x50   : > { %236 = vst [vmem:[#allocation2] sm:$0xf] %v669_v1  ;;  %237 = vst [vmem:[#allocation3] sm:$0xf] %v669_v1  ;;  %v242_v2 = vstv %s407_s18  ;;  %v247_v6 = vld [vmem:[%s200_s23] sm:$0xf] }
  0x51   : > { %v241_v3 = vshrl.u32 %v240_v0, 7  ;;  %s223_s21 = sand.u32 1, %s641_s10   ;;  %s409_s3 = sshll.u32 %s657_s14, 5  ;;  %vm277_vm2 = vcmask 1040384  }
  0x52   : > { %s406_s22 = sshll.u32 %s223_s21, 1  ;;  %s292_s5 = scalar_lea.hbm %s877_s2, %s409_s3 }
  0x53   : > { %v243_v4 = vadd.s32 %v242_v2, %v241_v3  ;;  %s225_s27 = scalar_lea.vmem [#allocation9], %s406_s22  ;;  %s281_s6 = scalar_lea.sflag [#allocation6], %s223_s21 }
  0x54   : > { %s294_s30 = sshll.u32 %s225_s27, 4  ;;  %p890_p9 = scmp.ne.s32.totalorder %s882_s25, 0  ;;  %s826_s30 = int_to_ptr.vmem [resolvable:$true] %s294_s30 }
  0x55   : > { %vm244_vm0 = vcmp.lt.s32.totalorder %v243_v4, 4  ;;  %s560_s7 = scalar_lea.vmem %s826_s30, 32  ;;  %s670_s14 = smov [#allocation9]  }
  0x56   : > { %v246_v7 = vsel %vm244_vm0, %v245_v5, 0.0  ;;  %v248_v8 = vsel %vm244_vm0, %v247_v6, 0.0  ;;  %p561_p2 = scmp.ne.s32.totalorder %s826_s30, %s560_s7  ;;  %s564_s8 = sshll.u32 %s670_s14, 4  ;;  %s565_s8 = int_to_ptr.vmem [resolvable:$false] %s564_s8 }
  0x57   : > { %v249_v9 = vld [vmem:[#allocation2] sm:$0xf]  ;;  %v253_v10 = vld [vmem:[#allocation3] sm:$0xf]  ;;  %v250_v11 = vmul.f32 %v248_v8, %v246_v7  ;;  %v254_v12 = vadd.f32 %v248_v8, %v246_v7  ;;  %s566_s12 = scalar_lea.vmem %s565_s8, 64  ;;  %p567_p0 = scmp.lt.s32.totalorder %s826_s30, %s565_s8 }
  0x58   : > { %p562_p12 = pnand %p561_p2, %p890_p9  ;;  %p568_p3 = scmp.lt.s32.totalorder %s566_s12, %s560_s7 }
  0x59   : > { %v251_v13 = vadd.f32 %v250_v11, %v249_v9  ;;  %v255_v14 = vadd.f32 %v254_v12, %v253_v10 }
  0x5a   : > { %p563_p13 = pneg %p562_p12  ;;  %p569_p5 = por %p568_p3, %p567_p0 }
  0x5b   : > { %252 = vst [vmem:[#allocation2] sm:$0xf] %v251_v13  ;;  %256 = vst [vmem:[#allocation3] sm:$0xf] %v255_v14 }
  0x5c   : > { %p570_p10 = pnand %p569_p5, %p563_p13 }
  0x62   : > { %v260_v15 = vld [vmem:[#allocation2] sm:$0xf]  ;;  %v269_v16 = vld [vmem:[#allocation3] sm:$0xf] }
  0x63   : > { %v262_v17 = vsel %vm261_vm1, %v260_v15, 0.0  ;;  %v270_v18 = vsel %vm261_vm1, %v269_v16, 0.0 }
  0x64   : > { %v263_v19 = vrot.slane %v262_v17, 4  ;;  %v271_v20 = vrot.slane %v270_v18, 4 }
  0x66   : > { %v264_v21 = vadd.f32 %v263_v19, %v262_v17  ;;  %v272_v22 = vadd.f32 %v271_v20, %v270_v18 }
  0x68   : > { %v265_v23 = vrot.slane %v264_v21, 2  ;;  %v273_v24 = vrot.slane %v272_v22, 2 }
  0x6a   : > { %v266_v25 = vadd.f32 %v265_v23, %v264_v21  ;;  %v274_v26 = vadd.f32 %v273_v24, %v272_v22 }
  0x6c   : > { %v267_v27 = vrot.slane %v266_v25, 1  ;;  %v275_v28 = vrot.slane %v274_v26, 1 }
  0x6e   : > { %v268_v29 = vadd.f32 %v267_v27, %v266_v25  ;;  %v276_v30 = vadd.f32 %v275_v28, %v274_v26 }
  0x70   : > { %v278_v31 = vsel %vm277_vm2, %v268_v29, %v276_v30 }
  0x71   : > { %279 = vst [vmem:[%s225_s27] sm:$0x3] %v278_v31 }
  0x72   : > { %573 = shalt.err (!%p570_p10)
}
  0x73   : > { %s574_s17 = scalar_lea.hbm %s292_s5, 32  ;;  %s578_s23 = scalar_lea.hbm %s877_s2, 64 }
  0x74   : > { %p575_p11 = scmp.ne.s32.totalorder %s292_s5, %s574_s17  ;;  %p579_p4 = scmp.lt.s32.totalorder %s292_s5, %s877_s2 }
  0x75   : > { %p580_p6 = scmp.lt.s32.totalorder %s578_s23, %s574_s17 }
  0x76   : > { %p576_p1 = pnand %p575_p11, %p890_p9 }
  0x77   : > { %p581_p8 = por %p580_p6, %p579_p4 }
  0x78   : > { %p577_p7 = pneg %p576_p1 }
  0x7a   : > { %p582_p2 = pnand %p581_p8, %p577_p7 }
  0x7c   : > { %585 = shalt.err (!%p582_p2)
}
  0x7d   : > { %416 = dma.vmem_to_hbm [thread:$0]  (%p890_p9), %s826_s30, 32, %s292_s5, %s281_s6  }
  0x7e PF: > { %s306_s22 = sand.u32 1, %s637_s9   ;;  %p891_p12 = scmp.ne.s32.totalorder %s883_s26, 0 }
  0x7f   : > { %p892_p13 = scmp.ge.s32.totalorder %s665_s16, 2  ;;  %s307_s27 = scalar_lea.sflag [#allocation6], %s306_s22 }
  0x81   : > { %p426_p0 = pnand %p892_p13, %p891_p12 }
  0x83   : > { %p427_p3 = pneg %p426_p0 }
  0x85   : > { %631 = dma.done.wait (%p427_p3), %s307_s27, 32  }
  0x86   : > { %633 = vsyncadd (%p427_p3), %s307_s27, 4294967264  ;;  %s21_s16 = sadd.s32 1, %s665_s16   ;;  %s893_s9 = smov %s641_s10 }
  0x87   : > { %p18_p5 = scmp.ge.s32.totalorder %s21_s16, 4   ;;  %s894_s10 = smov %s645_s11 }
  0x88   : > { %s895_s11 = smov %s744_s24  ;;  %s896_s12 = smov %s653_s13 }
  0x89   : > { %s865_s13 = smov 0   ;;  %s897_s14 = smov %s661_s15 }
  0x8a   : > { %s898_s15 = smov %s900_s19  ;;  %20 = sbr.rel (!%p18_p5) target bundleno = 9 (0x9), region = 94 }
  0x8f   :  { %312 = vsyncpa [#allocation5], 1 }
  0x90   :  { %314 = vsyncpa [#allocation5 + $0x1], 1 }
  0x91   :  { %315 = vsyncpa [#allocation8], 1 }
  0x92   :  { %317 = vsyncpa [#allocation8 + $0x1], 1 }
  0x93   :  { %318 = vsyncpa [#allocation6], 1 }
  0x94   :  { %320 = vsyncpa [#allocation6 + $0x1], 1 }

</bundles_post_ra>
